<compile_context>
chip_gen: v7x
topology: tpu7x:2x2x1
jax: 0.10.0
libtpu: 0.0.40
codegen_flags: <defaults>
</compile_context>

<pallas_src>
import functools

import jax
import jax.numpy as jnp
from jax.experimental import pallas as pl
from jax.experimental.pallas import tpu as pltpu

NORMALIZATION_FACTOR = 9.48933
LANES = 128             # atoms per lane row
MAX_BLOCK_ROWS = 2048   # 2048x128 atoms/step: 1 MiB in + 1 MiB out (i32/f32)
MIN_BLOCK_ROWS = 32     # sublane-tile safe for int8/int16/int32 blocks
TARGET_GRID_STEPS = 4   # keep >=4 grid steps so v7x's 2 TCs both get work
PALLAS_MIN_ATOMS = 1 << 16  # below this, a fused jnp where-chain wins


def _round_up(x: int, m: int) -> int:
    return -(-x // m) * m


def _fixed_charge_kernel(z_ref, out_ref, *, entries):
    # z_ref:   (block_rows, 128) int{16,32}  atomic numbers, lane-dense
    # out_ref: (block_rows, 128) float32     per-atom (pre-scaled) charge
    # entries: trace-time tuple of (atomic_number, charge * factor)
    z = z_ref[...]
    q = jnp.zeros(z.shape, dtype=jnp.float32)
    for zk, val in entries:  # unrolled at trace time; K is small
        q = jnp.where(z == jnp.asarray(zk, dtype=z.dtype), jnp.float32(val), q)
    out_ref[...] = q


def _fixed_charge_jnp(z, entries):
    # Same where-chain as the kernel, as a plain fused XLA elementwise op.
    q = jnp.zeros(z.shape, dtype=jnp.float32)
    for zk, val in entries:
        q = jnp.where(z == jnp.asarray(zk, dtype=z.dtype), jnp.float32(val), q)
    return q[:, None]


def fixed_charge(atomic_numbers: jax.Array,
                 charge_dict: dict,
                 normalize: bool = True,
                 use_pallas: bool | None = None) -> jax.Array:
    """Returns q of shape (N, 1) float32, matching FixedCharge.forward."""
    n = int(atomic_numbers.shape[0])
    factor = NORMALIZATION_FACTOR if normalize else 1.0
    # Fold the normalization factor into the trace-time lookup constants.
    entries = tuple((int(k), float(v) * factor) for k, v in charge_dict.items())

    if n == 0:
        return jnp.zeros((0, 1), jnp.float32)

    # Keep narrow integer inputs narrow (atomic numbers <= 118 fit in int16),
    # cast anything else to int32. No extra pass when the dtype already fits.
    z = atomic_numbers
    if z.dtype == jnp.int8:
        z = z.astype(jnp.int16)
    elif z.dtype not in (jnp.int16, jnp.int32):
        z = z.astype(jnp.int32)

    if use_pallas is None:
        use_pallas = n >= PALLAS_MIN_ATOMS
    if not use_pallas:
        return _fixed_charge_jnp(z, entries)

    # Lane-dense tiling: rows on the sublane axis, 128 atoms per row.
    rows = -(-n // LANES)
    block_rows = min(
        MAX_BLOCK_ROWS,
        _round_up(max(1, -(-rows // TARGET_GRID_STEPS)), MIN_BLOCK_ROWS),
    )
    rows_pad = _round_up(rows, block_rows)
    n_pad = rows_pad * LANES
    grid = rows_pad // block_rows

    if n_pad != n:
        z = jnp.pad(z, (0, n_pad - n))
    z2d = z.reshape(rows_pad, LANES)

    out2d = pl.pallas_call(
        functools.partial(_fixed_charge_kernel, entries=entries),
        out_shape=jax.ShapeDtypeStruct((rows_pad, LANES), jnp.float32),
        grid=(grid,),
        in_specs=[pl.BlockSpec((block_rows, LANES), lambda i: (i, 0))],
        out_specs=pl.BlockSpec((block_rows, LANES), lambda i: (i, 0)),
        compiler_params=pltpu.CompilerParams(
            dimension_semantics=("parallel",),
            allow_input_fusion=[True],
        ),
    )(z2d)

    flat = out2d.reshape(-1)
    if n_pad != n:
        flat = flat[:n]
    return flat[:, None]  # (N, 1)


if __name__ == "__main__":
    # Deterministic synthetic setup: a small "water-like" charge dict.
    charge_dict = {1: 0.4238, 6: 0.1200, 8: -0.8476}
    keys_arr = jnp.asarray(sorted(charge_dict.keys()), dtype=jnp.int32)

    def reference(z_concrete):
        ref = jnp.asarray([charge_dict[int(a)] for a in z_concrete],
                          dtype=jnp.float32)
        return ref[:, None] * NORMALIZATION_FACTOR

    # 1) Small system: auto-dispatch takes the fused-jnp fast path.
    n_small = 12
    idx = jax.random.randint(jax.random.PRNGKey(0), (n_small,), 0,
                             keys_arr.shape[0])
    z_small = keys_arr[idx]
    q_small = jax.block_until_ready(fixed_charge(z_small, charge_dict, True))
    assert q_small.shape == (n_small, 1)
    assert jnp.allclose(q_small, reference(z_small), atol=1e-5)

    # 2) Pallas path (forced): ragged N, exercises padding + slice.
    n_atoms = 300
    idx = jax.random.randint(jax.random.PRNGKey(0), (n_atoms,), 0,
                             keys_arr.shape[0])
    z = keys_arr[idx]
    q = jax.block_until_ready(
        fixed_charge(z, charge_dict, True, use_pallas=True))
    assert q.shape == (n_atoms, 1)
    assert jnp.allclose(q, reference(z), atol=1e-5)

    # 3) Pallas path, padding-free N with an int16 input (narrow-dtype read).
    n_even = MIN_BLOCK_ROWS * LANES  # 4096 atoms
    idx = jax.random.randint(jax.random.PRNGKey(1), (n_even,), 0,
                             keys_arr.shape[0])
    z16 = keys_arr[idx].astype(jnp.int16)
    q2 = jax.block_until_ready(
        fixed_charge(z16, charge_dict, True, use_pallas=True))
    assert q2.shape == (n_even, 1)
    assert jnp.allclose(q2, reference(keys_arr[idx]), atol=1e-5)

    print("KERNEL_OK")
</pallas_src>

<mosaic_0001>
module attributes {stable_mosaic.version = 11 : i64} {
  func.func @_fixed_charge_kernel(%arg0: i32, %arg1: memref<32x128xi32, #tpu.memory_space<vmem>>, %arg2: memref<32x128xf32, #tpu.memory_space<vmem>>) attributes {dimension_semantics = [#tpu.dimension_semantics<parallel>], iteration_bounds = array<i64: 1>, scalar_prefetch = 0 : i64, scratch_operands = 0 : i64, tpu.core_type = #tpu.core_type<tc>, window_params = [{transform_indices = @transform_0, window_bounds = array<i64: 32, 128>}, {transform_indices = @transform_1, window_bounds = array<i64: 32, 128>}]} {
    %c0 = arith.constant 0 : index
    %c0_0 = arith.constant 0 : index
    %0 = vector.load %arg1[%c0, %c0_0] : memref<32x128xi32, #tpu.memory_space<vmem>>, vector<32x128xi32>
    %cst = arith.constant 0.000000e+00 : f32
    %1 = vector.broadcast %cst : f32 to vector<32x128xf32>
    %c1_i32 = arith.constant 1 : i32
    %2 = vector.broadcast %c1_i32 : i32 to vector<32x128xi32>
    %3 = arith.cmpi eq, %0, %2 : vector<32x128xi32>
    %cst_1 = arith.constant 4.02157784 : f32
    %4 = vector.broadcast %cst_1 : f32 to vector<32x128xf32>
    %5 = arith.select %3, %4, %1 : vector<32x128xi1>, vector<32x128xf32>
    %c6_i32 = arith.constant 6 : i32
    %6 = vector.broadcast %c6_i32 : i32 to vector<32x128xi32>
    %7 = arith.cmpi eq, %0, %6 : vector<32x128xi32>
    %cst_2 = arith.constant 1.13871956 : f32
    %8 = vector.broadcast %cst_2 : f32 to vector<32x128xf32>
    %9 = arith.select %7, %8, %5 : vector<32x128xi1>, vector<32x128xf32>
    %c8_i32 = arith.constant 8 : i32
    %10 = vector.broadcast %c8_i32 : i32 to vector<32x128xi32>
    %11 = arith.cmpi eq, %0, %10 : vector<32x128xi32>
    %cst_3 = arith.constant -8.04315567 : f32
    %12 = vector.broadcast %cst_3 : f32 to vector<32x128xf32>
    %13 = arith.select %11, %12, %9 : vector<32x128xi1>, vector<32x128xf32>
    %c0_4 = arith.constant 0 : index
    %c0_5 = arith.constant 0 : index
    %14 = vector.load %arg2[%c0_4, %c0_5] : memref<32x128xf32, #tpu.memory_space<vmem>>, vector<32x128xf32>
    tpu.vector_store %arg2[%c0_4, %c0_5], %13 {strides = array<i32>} : memref<32x128xf32, #tpu.memory_space<vmem>>, vector<32x128xf32>,
    return
  }
  func.func @transform_0(%arg0: i32) -> (i32, i32) {
    %c0_i32 = arith.constant 0 : i32
    %c0_i32_0 = arith.constant 0 : i32
    return %arg0, %c0_i32 : i32, i32
  }
  func.func @transform_1(%arg0: i32) -> (i32, i32) {
    %c0_i32 = arith.constant 0 : i32
    %c0_i32_0 = arith.constant 0 : i32
    return %arg0, %c0_i32 : i32, i32
  }
}

</mosaic_0001>

<bundles_post_ra>
// kernel: tpu_custom_call.1
= control target key start
LH: loop header
LB: loop body
LE: loop exit
PB: predicated region body
PF: predicated region fallthrough
CT: control target
= control target key end

     0   :  { %6 = vsyncpa [#allocation3], 0  ;;  %s170_s0 = inlined_call_operand.hbm [shape: s32[32,128], index: 0, kind: input, shape index: {}]   ;;  %s171_s1 = inlined_call_operand.hbm [shape: f32[32,128], index: 1, kind: output, shape index: {}]  }
   0x1   :  { %7 = vsyncpa [#allocation4], 0  ;;  %s125_s6 = smov [#allocation2]   ;;  %s77_s10 = scalar_lea.hbm %s170_s0, 512 }
   0x2   :  { %s13_s7 = sshll.u32 %s125_s6, 4  ;;  %p78_p0 = scmp.ne.s32.totalorder %s170_s0, %s77_s10  ;;  %s14_s7 = int_to_ptr.vmem [resolvable:$true] %s13_s7 }
   0x3   :  { %p81_p1 = scmp.lt.u32.totalorder %s77_s10, %s170_s0 }
   0x5   :  { %p83_p2 = pnand %p81_p1, %p78_p0 }
   0x7   :  { %86 = shalt.err (!%p83_p2)
}
   0x8   :  { %s87_s15 = scalar_lea.vmem %s14_s7, 512  ;;  %p92_p4 = scmp.lt.s32.totalorder %s14_s7, %s14_s7 }
   0x9   :  { %p88_p3 = scmp.ne.s32.totalorder %s14_s7, %s87_s15  ;;  %p93_p5 = scmp.lt.s32.totalorder %s87_s15, %s87_s15 }
   0xb   :  { %p94_p6 = por %p93_p5, %p92_p4 }
   0xd   :  { %p95_p7 = pnand %p94_p6, %p88_p3 }
   0xf   :  { %98 = shalt.err (!%p95_p7)
}
  0x10   :  { %s126_s16 = smov 128   ;;  %s127_s17 = smov 8  }
  0x11   :  { %19 = dma.hbm_to_vmem [thread:$0]  %s170_s0, 512, %s14_s7, [#allocation3], %s126_s16, %s126_s16, %s127_s17  }
  0x12   :  { %121 = dma.done.wait [#allocation3], 512  }
  0x13   :  { %122 = vsyncadd [#allocation3], 4294966784  ;;  %v23_v0 = vld [vmem:[#allocation2] sm:$0xff]  ;;  %v24_v1 = vld [vmem:[#allocation2 + $0x8] sm:$0xff]  ;;  %s128_s20 = smov [#allocation5]   ;;  %v129_v4 = vmov 0.0  }
  0x14   :  { %v25_v2 = vld [vmem:[#allocation2 + $0x10] sm:$0xff]  ;;  %vm27_vm0 = vcmp.eq.s32.totalorder %v23_v0, 1  ;;  %vm35_vm1 = vcmp.eq.s32.totalorder %v23_v0, 6  ;;  %vm43_vm2 = vcmp.eq.s32.totalorder %v23_v0, 8  ;;  %vm28_vm3 = vcmp.eq.s32.totalorder %v24_v1, 1  ;;  %v26_v3 = vld [vmem:[#allocation2 + $0x18] sm:$0xff] }
  0x15   :  { %s60_s21 = sshll.u32 %s128_s20, 4  ;;  %v31_v5 = vsel %vm27_vm0, 4.021578, %v129_v4  ;;  %v32_v6 = vsel %vm28_vm3, 4.021578, %v129_v4  ;;  %vm36_vm4 = vcmp.eq.s32.totalorder %v24_v1, 6  ;;  %s61_s21 = int_to_ptr.vmem [resolvable:$true] %s60_s21 }
  0x16   :  { %vm44_vm5 = vcmp.eq.s32.totalorder %v24_v1, 8  ;;  %v39_v7 = vsel %vm35_vm1, 1.1387196, %v31_v5  ;;  %v40_v8 = vsel %vm36_vm4, 1.1387196, %v32_v6  ;;  %vm29_vm6 = vcmp.eq.s32.totalorder %v25_v2, 1  ;;  %p104_p9 = scmp.lt.s32.totalorder %s61_s21, %s61_s21 }
  0x17   :  { %vm37_vm7 = vcmp.eq.s32.totalorder %v25_v2, 6  ;;  %v47_v9 = vsel %vm43_vm2, -8.043156, %v39_v7  ;;  %v48_v10 = vsel %vm44_vm5, -8.043156, %v40_v8  ;;  %vm45_vm8 = vcmp.eq.s32.totalorder %v25_v2, 8 }
  0x18   :  { %v33_v11 = vsel %vm29_vm6, 4.021578, %v129_v4  ;;  %51 = vst [vmem:[#allocation5] sm:$0xff] %v47_v9  ;;  %52 = vst [vmem:[#allocation5 + $0x8] sm:$0xff] %v48_v10  ;;  %vm30_vm9 = vcmp.eq.s32.totalorder %v26_v3, 1  ;;  %vm38_vm10 = vcmp.eq.s32.totalorder %v26_v3, 6 }
  0x19   :  { %v41_v12 = vsel %vm37_vm7, 1.1387196, %v33_v11  ;;  %v34_v14 = vsel %vm30_vm9, 4.021578, %v129_v4  ;;  %vm46_vm11 = vcmp.eq.s32.totalorder %v26_v3, 8  ;;  %s99_s0 = scalar_lea.vmem %s61_s21, 512 }
  0x1a   :  { %v49_v13 = vsel %vm45_vm8, -8.043156, %v41_v12  ;;  %v42_v15 = vsel %vm38_vm10, 1.1387196, %v34_v14  ;;  %p100_p8 = scmp.ne.s32.totalorder %s61_s21, %s99_s0  ;;  %p105_p10 = scmp.lt.s32.totalorder %s99_s0, %s99_s0 }
  0x1b   :  { %53 = vst [vmem:[#allocation5 + $0x10] sm:$0xff] %v49_v13  ;;  %v50_v16 = vsel %vm46_vm11, -8.043156, %v42_v15 }
  0x1c   :  { %54 = vst [vmem:[#allocation5 + $0x18] sm:$0xff] %v50_v16  ;;  %p106_p11 = por %p105_p10, %p104_p9 }
  0x1e   :  { %p107_p12 = pnand %p106_p11, %p100_p8 }
  0x20   :  { %110 = shalt.err (!%p107_p12)
}
  0x21   :  { %s111_s24 = scalar_lea.hbm %s171_s1, 512 }
  0x22   :  { %p112_p13 = scmp.ne.s32.totalorder %s171_s1, %s111_s24  ;;  %p115_p0 = scmp.lt.u32.totalorder %s111_s24, %s171_s1 }
  0x24   :  { %p117_p1 = pnand %p115_p0, %p112_p13 }
  0x26   :  { %120 = shalt.err (!%p117_p1)
}
  0x27   :  { %66 = dma.vmem_to_hbm [thread:$0]  %s61_s21, 512, %s171_s1, [#allocation4], %s126_s16, %s126_s16, %s127_s17  }
  0x28   :  { %123 = dma.done.wait [#allocation4], 512  }
  0x29   :  { %124 = vsyncadd [#allocation4], 4294966784 }
  0x2a   :  { %70 = vsyncpa [#allocation3], 1 }
  0x2b   :  { %71 = vsyncpa [#allocation4], 1 }

</bundles_post_ra>
